<compile_context>
chip_gen: v6e
topology: v6e:2x2x1
jax: 0.10.0
libtpu: 0.0.40
codegen_flags: <defaults>
</compile_context>

<pallas_src>
import functools

import jax
import jax.numpy as jnp
from jax import lax
from jax.experimental import pallas as pl
from jax.experimental.pallas import tpu as pltpu


def fasttext_kernel(ids_ref, cat_ids_ref, emb_ref, cat_emb_ref, w_ref, b_ref,
                    out_ref, acc_ref, *, nz_col, cat_offsets):
    """Grid = (batch_tiles [parallel], vocab_tiles [arbitrary])."""
    k = pl.program_id(1)
    nk = pl.num_programs(1)

    @pl.when(k == 0)
    def _init():
        acc_ref[...] = jnp.zeros_like(acc_ref)

    ids = ids_ref[...]                                   # (TB, T) int32
    TB, T = ids.shape
    TV, _ = emb_ref.shape
    v0 = k * TV                                          # element offset of this vocab chunk

    # counts[b, v] = #tokens in row b equal to vocab id v0+v (padding tokens
    # included: the padding row of the padded table is all-zero, so they add 0
    # to the sum and 0 to the indicator column).
    # 2-D per-token accumulation: live state stays at a few vregs, no XLU reduce.
    iota_v = lax.broadcasted_iota(jnp.int32, (TB, TV), 1) + v0   # hoisted out of the T loop
    counts = jnp.zeros((TB, TV), jnp.float32)
    for t in range(T):                                   # T is a trace-time constant
        counts = counts + (ids[:, t:t + 1] == iota_v).astype(jnp.float32)

    # single cast before the dot; per-row counts <= T <= 256 are exact in bf16
    counts = counts.astype(emb_ref.dtype) if T <= 256 else counts

    # acc += counts @ emb_chunk   (MXU, bf16 in / f32 accumulate)
    acc_ref[...] += jnp.dot(counts, emb_ref[...], preferred_element_type=jnp.float32)

    @pl.when(k == nk - 1)
    def _finish():
        acc = acc_ref[...]                               # (TB, D_pad) f32
        # Column `nz_col` of the padded table is the "embedding-row sum != 0"
        # indicator, so acc[:, nz_col] == torch's non_zero_tokens per row.
        nz = acc[:, nz_col:nz_col + 1]                   # (TB, 1)
        inv = pl.reciprocal(jnp.maximum(nz, 1.0), approx=True)     # EUP slot
        x1 = jnp.where(nz == 0.0, 0.0, acc * inv)        # masked mean; 0/0 -> 0 (nan_to_num)

        # Fused categorical lookups: one two-hot matmul against the concat table.
        # TODO(synk): out-of-range/negative categorical ids silently produce a
        # zero embedding here, whereas torch nn.Embedding would raise.
        cat_ids = cat_ids_ref[...]                       # (TB, C) int32
        Vc = cat_emb_ref.shape[0]
        iota_c = lax.broadcasted_iota(jnp.int32, (TB, Vc), 1)
        hot = jnp.zeros((TB, Vc), jnp.float32)
        for i, off in enumerate(cat_offsets):
            hot = hot + (cat_ids[:, i:i + 1] + off == iota_c).astype(jnp.float32)
        x_cat = jnp.dot(hot.astype(cat_emb_ref.dtype), cat_emb_ref[...],
                        preferred_element_type=jnp.float32)        # (TB, D_pad)

        # final linear layer (f32); padded rows of W are zero so the indicator /
        # padding columns of x_in contribute nothing.
        x_in = x1 + x_cat
        out_ref[...] = (jnp.dot(x_in, w_ref[...], preferred_element_type=jnp.float32)
                        + b_ref[...])


def _round_up(x, q):
    return ((x + q - 1) // q) * q


def _pick_tile(total, preferred, quantum):
    """Largest multiple of `quantum` dividing `total` and <= preferred; else `total`."""
    if total <= preferred:
        return total
    t = (min(preferred, total) // quantum) * quantum
    while t >= quantum:
        if total % t == 0:
            return t
        t -= quantum
    return total


def fasttext_forward(encoded_text, additional_inputs, emb, cat_embs, fc_w_t, fc_b,
                     *, padding_idx=0, b_tile=None, v_tile=None):
    B, T = encoded_text.shape
    V, D = emb.shape
    K = fc_w_t.shape[1]
    C = additional_inputs.shape[0]

    # ---- pad feature dims to the 128-lane width (lane-dense MXU / stores) ----
    # One spare column (index D) of the padded text table carries the
    # "row-sum != 0" indicator so the token-count denominator falls out of the
    # same counts @ table matmul.
    D_pad = _round_up(D + 1, 128)
    K_pad = _round_up(K, 128)
    nz_col = D

    indicator = (jnp.sum(emb.astype(jnp.float32), axis=-1) != 0).astype(emb.dtype)   # (V,)
    emb_pad = (jnp.zeros((V, D_pad), emb.dtype)
               .at[:, :D].set(emb)
               .at[:, nz_col].set(indicator))

    cat_sizes = [int(t.shape[0]) for t in cat_embs]
    cat_offsets, off = [], 0
    for s in cat_sizes:
        cat_offsets.append(off)
        off += s
    cat_table = jnp.concatenate(list(cat_embs), axis=0)           # (Vc_tot, D)
    Vc_tot = cat_table.shape[0]
    cat_table_pad = jnp.zeros((Vc_tot, D_pad), cat_table.dtype).at[:, :D].set(cat_table)

    w_pad = jnp.zeros((D_pad, K_pad), jnp.float32).at[:D, :K].set(fc_w_t.astype(jnp.float32))
    b_pad = jnp.zeros((1, K_pad), jnp.float32).at[:, :K].set(fc_b.astype(jnp.float32))

    # ---- pad the batch to a sublane multiple (padded rows sliced off below) ----
    B_pad = _round_up(max(B, 8), 8)
    ids = jnp.full((B_pad, T), padding_idx, jnp.int32).at[:B].set(encoded_text.astype(jnp.int32))
    cat_ids = jnp.zeros((B_pad, C), jnp.int32).at[:B].set(
        jnp.transpose(additional_inputs).astype(jnp.int32))

    # ---- tile selection ----
    if b_tile is not None:
        TB = b_tile
    else:
        pref_tb = 128
        if B_pad >= 16:
            pref_tb = min(pref_tb, B_pad // 2)     # nb >= 2 -> both v7x TensorCores get work
        TB = _pick_tile(B_pad, pref_tb, 8)
    ebytes = jnp.dtype(emb.dtype).itemsize
    if v_tile is not None:
        TV = v_tile
    else:
        # keep the double-buffered vocab chunk under ~8 MiB, cap at 4096 rows
        tv_cap = max(8, (((8 << 20) // (2 * D_pad * ebytes)) // 8) * 8)
        TV = _pick_tile(V, min(4096, tv_cap), 8)
    assert B_pad % TB == 0, f"batch tile {TB} must divide padded batch {B_pad}"
    assert V % TV == 0, f"vocab tile {TV} must divide V={V}"
    nb, nk = B_pad // TB, V // TV

    # ---- explicit VMEM budget ----
    vmem_need = (
        2 * TV * D_pad * ebytes            # streamed vocab chunk (double-buffered)
        + 2 * Vc_tot * D_pad * ebytes      # concat cat table
        + 2 * D_pad * K_pad * 4            # fc weight
        + 2 * 8 * K_pad * 4                # fc bias (sublane-padded)
        + 2 * TB * max(T, 128) * 4         # token ids block (lane-padded)
        + 2 * TB * 128 * 4                 # categorical ids block
        + 2 * TB * K_pad * 4               # output block
        + TB * D_pad * 4                   # f32 accumulator scratch
        + 2 * TB * TV * 4                  # live counts / temporaries headroom
    )
    vmem_limit = int(min(max(vmem_need * 2 + (4 << 20), 32 << 20), 64 << 20))

    kernel = functools.partial(fasttext_kernel, nz_col=nz_col,
                               cat_offsets=tuple(cat_offsets))

    # truthful cost hint: the table is re-streamed once per batch tile, and the
    # id==v compare scan is counted.
    flops = (2 * B_pad * V * D_pad + B_pad * T * V
             + 2 * B_pad * Vc_tot * D_pad + 2 * B_pad * D_pad * K_pad)
    bytes_accessed = (nb * V * D_pad * ebytes + Vc_tot * D_pad * ebytes
                      + D_pad * K_pad * 4 + K_pad * 4
                      + B_pad * (T + C) * 4 + B_pad * K_pad * 4)

    grid_spec = pltpu.PrefetchScalarGridSpec(
        num_scalar_prefetch=0,
        grid=(nb, nk),
        in_specs=[
            pl.BlockSpec((TB, T), lambda i, k: (i, 0)),          # token ids
            pl.BlockSpec((TB, C), lambda i, k: (i, 0)),          # categorical ids
            pl.BlockSpec((TV, D_pad), lambda i, k: (k, 0)),      # streamed vocab chunk
            pl.BlockSpec((Vc_tot, D_pad), lambda i, k: (0, 0)),  # concat cat table (constant block)
            pl.BlockSpec((D_pad, K_pad), lambda i, k: (0, 0)),   # fc weight (constant block)
            pl.BlockSpec((1, K_pad), lambda i, k: (0, 0)),       # fc bias (constant block)
        ],
        out_specs=pl.BlockSpec((TB, K_pad), lambda i, k: (i, 0)),
        scratch_shapes=[pltpu.VMEM((TB, D_pad), jnp.float32)],   # sum-of-embeddings accumulator
    )

    out = pl.pallas_call(
        kernel,
        out_shape=jax.ShapeDtypeStruct((B_pad, K_pad), jnp.float32),
        grid_spec=grid_spec,
        compiler_params=pltpu.CompilerParams(
            dimension_semantics=("parallel", "arbitrary"),
            vmem_limit_bytes=vmem_limit),
        cost_estimate=pl.CostEstimate(flops=int(flops), transcendentals=int(B_pad),
                                      bytes_accessed=int(bytes_accessed)),
    )(ids, cat_ids, emb_pad, cat_table_pad, w_pad, b_pad)

    return out[:B, :K]


def reference_forward(encoded_text, additional_inputs, emb, cat_embs, fc_w_t, fc_b):
    """Plain-JAX replica of the PyTorch forward (evaluated on the same bf16-stored tables)."""
    emb32 = emb.astype(jnp.float32)
    x1 = emb32[encoded_text]                                 # (B, T, D)
    nz = jnp.sum(jnp.sum(x1, axis=-1) != 0, axis=-1)         # (B,) — torch's non_zero_tokens
    x1 = jnp.sum(x1, axis=-2) / nz[:, None].astype(jnp.float32)
    x1 = jnp.nan_to_num(x1)
    x_cat = sum(cat_embs[i].astype(jnp.float32)[additional_inputs[i]]
                for i in range(len(cat_embs)))
    return (x1 + x_cat) @ fc_w_t + fc_b


if __name__ == "__main__":
    # small shapes consistent with the module
    B, T, D = 2, 8, 32
    vocab_size, num_classes = 64, 16
    cat_vocab_sizes = [8, 12]
    padding_idx = 0

    key = jax.random.PRNGKey(0)
    k_ids, k_cat0, k_cat1, k_emb, k_c0, k_c1, k_w, k_b = jax.random.split(key, 8)

    # token ids with explicit padding at the end of each sequence
    encoded_text = jax.random.randint(k_ids, (B, T), 1, vocab_size, dtype=jnp.int32)
    encoded_text = encoded_text.at[:, -2:].set(padding_idx)

    # categorical inputs: (C, B), matching `additional_inputs[i]` indexing in torch
    additional_inputs = jnp.stack([
        jax.random.randint(k_cat0, (B,), 0, cat_vocab_sizes[0], dtype=jnp.int32),
        jax.random.randint(k_cat1, (B,), 0, cat_vocab_sizes[1], dtype=jnp.int32),
    ], axis=0)

    # nn.Embedding ~ N(0,1), padding row zeroed; tables stored bf16 (MXU-native)
    emb = jax.random.normal(k_emb, (vocab_size, D), jnp.float32).at[padding_idx].set(0.0)
    cat_emb0 = jax.random.normal(k_c0, (cat_vocab_sizes[0], D), jnp.float32)
    cat_emb1 = jax.random.normal(k_c1, (cat_vocab_sizes[1], D), jnp.float32)
    emb_bf16 = emb.astype(jnp.bfloat16)
    cat_embs_bf16 = [cat_emb0.astype(jnp.bfloat16), cat_emb1.astype(jnp.bfloat16)]

    # nn.Linear(D, num_classes): weight stored transposed as (D, K); kept f32
    bound = 1.0 / (D ** 0.5)
    fc_w_t = jax.random.uniform(k_w, (D, num_classes), jnp.float32, -bound, bound)
    fc_b = jax.random.uniform(k_b, (1, num_classes), jnp.float32, -bound, bound)

    # v_tile=32 exercises the multi-step vocab accumulation path even at V=64.
    out = fasttext_forward(encoded_text, additional_inputs, emb_bf16, cat_embs_bf16,
                           fc_w_t, fc_b, padding_idx=padding_idx, v_tile=32)
    out = jax.block_until_ready(out)

    ref = reference_forward(encoded_text, additional_inputs, emb_bf16, cat_embs_bf16,
                            fc_w_t, fc_b)
    assert out.shape == (B, num_classes)
    assert jnp.allclose(out, ref, atol=5e-3, rtol=5e-3), float(jnp.max(jnp.abs(out - ref)))

    print("KERNEL_OK")
</pallas_src>

<mosaic_0001>
module attributes {stable_mosaic.version = 11 : i64} {
  func.func @fasttext_kernel(%arg0: i32, %arg1: i32, %arg2: memref<8x8xi32, #tpu.memory_space<vmem>>, %arg3: memref<8x2xi32, #tpu.memory_space<vmem>>, %arg4: memref<32x128xbf16, #tpu.memory_space<vmem>>, %arg5: memref<20x128xbf16, #tpu.memory_space<vmem>>, %arg6: memref<128x128xf32, #tpu.memory_space<vmem>>, %arg7: memref<1x128xf32, #tpu.memory_space<vmem>>, %arg8: memref<8x128xf32, #tpu.memory_space<vmem>>, %arg9: memref<8x128xf32, #tpu.memory_space<vmem>>) attributes {dimension_semantics = [#tpu.dimension_semantics<parallel>, #tpu.dimension_semantics<arbitrary>], iteration_bounds = array<i64: 1, 2>, scalar_prefetch = 0 : i64, scratch_operands = 1 : i64, tpu.core_type = #tpu.core_type<tc>, window_params = [{transform_indices = @transform_0, window_bounds = array<i64: 8, 8>}, {transform_indices = @transform_1, window_bounds = array<i64: 8, 2>}, {transform_indices = @transform_2, window_bounds = array<i64: 32, 128>}, {pipeline_mode = #tpu.pipeline_mode<synchronous>, transform_indices = @transform_3, window_bounds = array<i64: 20, 128>}, {pipeline_mode = #tpu.pipeline_mode<synchronous>, transform_indices = @transform_4, window_bounds = array<i64: 128, 128>}, {pipeline_mode = #tpu.pipeline_mode<synchronous>, transform_indices = @transform_5, window_bounds = array<i64: 1, 128>}, {transform_indices = @transform_6, window_bounds = array<i64: 8, 128>}]} {
    %c0_i32 = arith.constant 0 : i32
    %0 = arith.cmpi eq, %arg1, %c0_i32 : i32
    %1 = arith.extui %0 : i1 to i32
    %c0_i32_0 = arith.constant 0 : i32
    %2 = arith.cmpi ne, %1, %c0_i32_0 : i32
    scf.if %2 {
      %cst_10 = arith.constant 0.000000e+00 : f32
      %66 = vector.broadcast %cst_10 : f32 to vector<8x128xf32>
      %c0_11 = arith.constant 0 : index
      %c0_12 = arith.constant 0 : index
      %67 = vector.load %arg9[%c0_11, %c0_12] : memref<8x128xf32, #tpu.memory_space<vmem>>, vector<8x128xf32>
      tpu.vector_store %arg9[%c0_11, %c0_12], %66 {strides = array<i32>} : memref<8x128xf32, #tpu.memory_space<vmem>>, vector<8x128xf32>,
    } else {
    }
    %c0 = arith.constant 0 : index
    %c0_1 = arith.constant 0 : index
    %3 = vector.load %arg2[%c0, %c0_1] : memref<8x8xi32, #tpu.memory_space<vmem>>, vector<8x8xi32>
    %c32_i32 = arith.constant 32 : i32
    %4 = arith.muli %arg1, %c32_i32 : i32
    %5 = tpu.iota {dimensions = array<i32: 1>} : vector<8x32xi32>
    %6 = vector.broadcast %4 : i32 to vector<8x32xi32>
    %7 = arith.addi %5, %6 : vector<8x32xi32>
    %cst = arith.constant 0.000000e+00 : f32
    %8 = vector.broadcast %cst : f32 to vector<8x32xf32>
    %9 = vector.extract_strided_slice %3 {offsets = [0, 0], sizes = [8, 1], strides = [1, 1]} : vector<8x8xi32> to vector<8x1xi32>
    %10 = vector.broadcast %9 : vector<8x1xi32> to vector<8x32xi32>
    %11 = arith.cmpi eq, %10, %7 : vector<8x32xi32>
    %12 = arith.extui %11 : vector<8x32xi1> to vector<8x32xi32>
    %13 = arith.sitofp %12 : vector<8x32xi32> to vector<8x32xf32>
    %14 = arith.addf %8, %13 : vector<8x32xf32>
    %15 = vector.extract_strided_slice %3 {offsets = [0, 1], sizes = [8, 1], strides = [1, 1]} : vector<8x8xi32> to vector<8x1xi32>
    %16 = vector.broadcast %15 : vector<8x1xi32> to vector<8x32xi32>
    %17 = arith.cmpi eq, %16, %7 : vector<8x32xi32>
    %18 = arith.extui %17 : vector<8x32xi1> to vector<8x32xi32>
    %19 = arith.sitofp %18 : vector<8x32xi32> to vector<8x32xf32>
    %20 = arith.addf %14, %19 : vector<8x32xf32>
    %21 = vector.extract_strided_slice %3 {offsets = [0, 2], sizes = [8, 1], strides = [1, 1]} : vector<8x8xi32> to vector<8x1xi32>
    %22 = vector.broadcast %21 : vector<8x1xi32> to vector<8x32xi32>
    %23 = arith.cmpi eq, %22, %7 : vector<8x32xi32>
    %24 = arith.extui %23 : vector<8x32xi1> to vector<8x32xi32>
    %25 = arith.sitofp %24 : vector<8x32xi32> to vector<8x32xf32>
    %26 = arith.addf %20, %25 : vector<8x32xf32>
    %27 = vector.extract_strided_slice %3 {offsets = [0, 3], sizes = [8, 1], strides = [1, 1]} : vector<8x8xi32> to vector<8x1xi32>
    %28 = vector.broadcast %27 : vector<8x1xi32> to vector<8x32xi32>
    %29 = arith.cmpi eq, %28, %7 : vector<8x32xi32>
    %30 = arith.extui %29 : vector<8x32xi1> to vector<8x32xi32>
    %31 = arith.sitofp %30 : vector<8x32xi32> to vector<8x32xf32>
    %32 = arith.addf %26, %31 : vector<8x32xf32>
    %33 = vector.extract_strided_slice %3 {offsets = [0, 4], sizes = [8, 1], strides = [1, 1]} : vector<8x8xi32> to vector<8x1xi32>
    %34 = vector.broadcast %33 : vector<8x1xi32> to vector<8x32xi32>
    %35 = arith.cmpi eq, %34, %7 : vector<8x32xi32>
    %36 = arith.extui %35 : vector<8x32xi1> to vector<8x32xi32>
    %37 = arith.sitofp %36 : vector<8x32xi32> to vector<8x32xf32>
    %38 = arith.addf %32, %37 : vector<8x32xf32>
    %39 = vector.extract_strided_slice %3 {offsets = [0, 5], sizes = [8, 1], strides = [1, 1]} : vector<8x8xi32> to vector<8x1xi32>
    %40 = vector.broadcast %39 : vector<8x1xi32> to vector<8x32xi32>
    %41 = arith.cmpi eq, %40, %7 : vector<8x32xi32>
    %42 = arith.extui %41 : vector<8x32xi1> to vector<8x32xi32>
    %43 = arith.sitofp %42 : vector<8x32xi32> to vector<8x32xf32>
    %44 = arith.addf %38, %43 : vector<8x32xf32>
    %45 = vector.extract_strided_slice %3 {offsets = [0, 6], sizes = [8, 1], strides = [1, 1]} : vector<8x8xi32> to vector<8x1xi32>
    %46 = vector.broadcast %45 : vector<8x1xi32> to vector<8x32xi32>
    %47 = arith.cmpi eq, %46, %7 : vector<8x32xi32>
    %48 = arith.extui %47 : vector<8x32xi1> to vector<8x32xi32>
    %49 = arith.sitofp %48 : vector<8x32xi32> to vector<8x32xf32>
    %50 = arith.addf %44, %49 : vector<8x32xf32>
    %51 = vector.extract_strided_slice %3 {offsets = [0, 7], sizes = [8, 1], strides = [1, 1]} : vector<8x8xi32> to vector<8x1xi32>
    %52 = vector.broadcast %51 : vector<8x1xi32> to vector<8x32xi32>
    %53 = arith.cmpi eq, %52, %7 : vector<8x32xi32>
    %54 = arith.extui %53 : vector<8x32xi1> to vector<8x32xi32>
    %55 = arith.sitofp %54 : vector<8x32xi32> to vector<8x32xf32>
    %56 = arith.addf %50, %55 : vector<8x32xf32>
    %57 = arith.truncf %56 : vector<8x32xf32> to vector<8x32xbf16>
    %c0_2 = arith.constant 0 : index
    %c0_3 = arith.constant 0 : index
    %58 = vector.load %arg9[%c0_2, %c0_3] : memref<8x128xf32, #tpu.memory_space<vmem>>, vector<8x128xf32>
    %c0_4 = arith.constant 0 : index
    %c0_5 = arith.constant 0 : index
    %59 = vector.load %arg4[%c0_4, %c0_5] : memref<32x128xbf16, #tpu.memory_space<vmem>>, vector<32x128xbf16>
    %cst_6 = arith.constant dense<0.000000e+00> : vector<8x128xf32>
    %60 = tpu.matmul %57, %59, %cst_6 {dimension_numbers = #tpu.dot_dimension_numbers<[1], [0], [0], [1], [0, 0, 1, 1], [], []>} : vector<8x32xbf16>, vector<32x128xbf16>, vector<8x128xf32> -> vector<8x128xf32>
    %61 = arith.addf %58, %60 : vector<8x128xf32>
    %c0_7 = arith.constant 0 : index
    %c0_8 = arith.constant 0 : index
    %62 = vector.load %arg9[%c0_7, %c0_8] : memref<8x128xf32, #tpu.memory_space<vmem>>, vector<8x128xf32>
    tpu.vector_store %arg9[%c0_7, %c0_8], %61 {strides = array<i32>} : memref<8x128xf32, #tpu.memory_space<vmem>>, vector<8x128xf32>,
    %c1_i32 = arith.constant 1 : i32
    %63 = arith.cmpi eq, %arg1, %c1_i32 : i32
    %64 = arith.extui %63 : i1 to i32
    %c0_i32_9 = arith.constant 0 : i32
    %65 = arith.cmpi ne, %64, %c0_i32_9 : i32
    scf.if %65 {
      %c0_10 = arith.constant 0 : index
      %c0_11 = arith.constant 0 : index
      %66 = vector.load %arg9[%c0_10, %c0_11] : memref<8x128xf32, #tpu.memory_space<vmem>>, vector<8x128xf32>
      %67 = vector.extract_strided_slice %66 {offsets = [0, 32], sizes = [8, 1], strides = [1, 1]} : vector<8x128xf32> to vector<8x1xf32>
      %cst_12 = arith.constant 1.000000e+00 : f32
      %68 = vector.broadcast %cst_12 : f32 to vector<8x1xf32>
      %69 = arith.maximumf %67, %68 : vector<8x1xf32>
      %70 = tpu.reciprocal %69 {approx = true} : vector<8x1xf32> -> vector<8x1xf32>
      %cst_13 = arith.constant 0.000000e+00 : f32
      %71 = vector.broadcast %cst_13 : f32 to vector<8x1xf32>
      %72 = arith.cmpf oeq, %67, %71 : vector<8x1xf32>
      %73 = vector.broadcast %70 : vector<8x1xf32> to vector<8x128xf32>
      %74 = arith.mulf %66, %73 : vector<8x128xf32>
      %cst_14 = arith.constant 0.000000e+00 : f32
      %75 = vector.shape_cast %72 : vector<8x1xi1> to vector<8x1xi1>
      %76 = vector.broadcast %75 : vector<8x1xi1> to vector<8x128xi1>
      %77 = vector.broadcast %cst_14 : f32 to vector<8x128xf32>
      %78 = arith.select %76, %77, %74 : vector<8x128xi1>, vector<8x128xf32>
      %c0_15 = arith.constant 0 : index
      %c0_16 = arith.constant 0 : index
      %79 = vector.load %arg3[%c0_15, %c0_16] : memref<8x2xi32, #tpu.memory_space<vmem>>, vector<8x2xi32>
      %80 = tpu.iota {dimensions = array<i32: 1>} : vector<8x20xi32>
      %cst_17 = arith.constant 0.000000e+00 : f32
      %81 = vector.broadcast %cst_17 : f32 to vector<8x20xf32>
      %82 = vector.extract_strided_slice %79 {offsets = [0, 0], sizes = [8, 1], strides = [1, 1]} : vector<8x2xi32> to vector<8x1xi32>
      %c0_i32_18 = arith.constant 0 : i32
      %83 = vector.broadcast %c0_i32_18 : i32 to vector<8x1xi32>
      %84 = arith.addi %82, %83 : vector<8x1xi32>
      %85 = vector.broadcast %84 : vector<8x1xi32> to vector<8x20xi32>
      %86 = arith.cmpi eq, %85, %80 : vector<8x20xi32>
      %87 = arith.extui %86 : vector<8x20xi1> to vector<8x20xi32>
      %88 = arith.sitofp %87 : vector<8x20xi32> to vector<8x20xf32>
      %89 = arith.addf %81, %88 : vector<8x20xf32>
      %90 = vector.extract_strided_slice %79 {offsets = [0, 1], sizes = [8, 1], strides = [1, 1]} : vector<8x2xi32> to vector<8x1xi32>
      %c8_i32 = arith.constant 8 : i32
      %91 = vector.broadcast %c8_i32 : i32 to vector<8x1xi32>
      %92 = arith.addi %90, %91 : vector<8x1xi32>
      %93 = vector.broadcast %92 : vector<8x1xi32> to vector<8x20xi32>
      %94 = arith.cmpi eq, %93, %80 : vector<8x20xi32>
      %95 = arith.extui %94 : vector<8x20xi1> to vector<8x20xi32>
      %96 = arith.sitofp %95 : vector<8x20xi32> to vector<8x20xf32>
      %97 = arith.addf %89, %96 : vector<8x20xf32>
      %98 = arith.truncf %97 : vector<8x20xf32> to vector<8x20xbf16>
      %c0_19 = arith.constant 0 : index
      %c0_20 = arith.constant 0 : index
      %99 = vector.load %arg5[%c0_19, %c0_20] : memref<20x128xbf16, #tpu.memory_space<vmem>>, vector<20x128xbf16>
      %cst_21 = arith.constant dense<0.000000e+00> : vector<8x128xf32>
      %100 = tpu.matmul %98, %99, %cst_21 {dimension_numbers = #tpu.dot_dimension_numbers<[1], [0], [0], [1], [0, 0, 1, 1], [], []>} : vector<8x20xbf16>, vector<20x128xbf16>, vector<8x128xf32> -> vector<8x128xf32>
      %101 = arith.addf %78, %100 : vector<8x128xf32>
      %c0_22 = arith.constant 0 : index
      %c0_23 = arith.constant 0 : index
      %102 = vector.load %arg6[%c0_22, %c0_23] : memref<128x128xf32, #tpu.memory_space<vmem>>, vector<128x128xf32>
      %cst_24 = arith.constant dense<0.000000e+00> : vector<8x128xf32>
      %103 = tpu.matmul %101, %102, %cst_24 {dimension_numbers = #tpu.dot_dimension_numbers<[1], [0], [0], [1], [0, 0, 1, 1], [], []>} : vector<8x128xf32>, vector<128x128xf32>, vector<8x128xf32> -> vector<8x128xf32>
      %c0_25 = arith.constant 0 : index
      %c0_26 = arith.constant 0 : index
      %104 = vector.load %arg7[%c0_25, %c0_26] : memref<1x128xf32, #tpu.memory_space<vmem>>, vector<1x128xf32>
      %105 = vector.broadcast %104 : vector<1x128xf32> to vector<8x128xf32>
      %106 = arith.addf %103, %105 : vector<8x128xf32>
      %c0_27 = arith.constant 0 : index
      %c0_28 = arith.constant 0 : index
      %107 = vector.load %arg8[%c0_27, %c0_28] : memref<8x128xf32, #tpu.memory_space<vmem>>, vector<8x128xf32>
      tpu.vector_store %arg8[%c0_27, %c0_28], %106 {strides = array<i32>} : memref<8x128xf32, #tpu.memory_space<vmem>>, vector<8x128xf32>,
    } else {
    }
    return
  }
  func.func @transform_0(%arg0: i32, %arg1: i32) -> (i32, i32) {
    %c0_i32 = arith.constant 0 : i32
    %c0_i32_0 = arith.constant 0 : i32
    return %arg0, %c0_i32 : i32, i32
  }
  func.func @transform_1(%arg0: i32, %arg1: i32) -> (i32, i32) {
    %c0_i32 = arith.constant 0 : i32
    %c0_i32_0 = arith.constant 0 : i32
    return %arg0, %c0_i32 : i32, i32
  }
  func.func @transform_2(%arg0: i32, %arg1: i32) -> (i32, i32) {
    %c0_i32 = arith.constant 0 : i32
    %c0_i32_0 = arith.constant 0 : i32
    return %arg1, %c0_i32 : i32, i32
  }
  func.func @transform_3(%arg0: i32, %arg1: i32) -> (i32, i32) {
    %c0_i32 = arith.constant 0 : i32
    %c0_i32_0 = arith.constant 0 : i32
    %c0_i32_1 = arith.constant 0 : i32
    return %c0_i32, %c0_i32_0 : i32, i32
  }
  func.func @transform_4(%arg0: i32, %arg1: i32) -> (i32, i32) {
    %c0_i32 = arith.constant 0 : i32
    %c0_i32_0 = arith.constant 0 : i32
    %c0_i32_1 = arith.constant 0 : i32
    return %c0_i32, %c0_i32_0 : i32, i32
  }
  func.func @transform_5(%arg0: i32, %arg1: i32) -> (i32, i32) {
    %c0_i32 = arith.constant 0 : i32
    %c0_i32_0 = arith.constant 0 : i32
    %c0_i32_1 = arith.constant 0 : i32
    return %c0_i32, %c0_i32_0 : i32, i32
  }
  func.func @transform_6(%arg0: i32, %arg1: i32) -> (i32, i32) {
    %c0_i32 = arith.constant 0 : i32
    %c0_i32_0 = arith.constant 0 : i32
    return %arg0, %c0_i32 : i32, i32
  }
}

</mosaic_0001>

<bundles_post_ra>
// kernel: tpu_custom_call.1
= control target key start
LH: loop header
LB: loop body
LE: loop exit
PB: predicated region body
PF: predicated region fallthrough
CT: control target
= control target key end

     0   :  { %s1417_s0 = inlined_call_operand.hbm [shape: s32[8,8], index: 0, kind: input, shape index: {}]   ;;  %s1418_s1 = inlined_call_operand.vmem [shape: s32[8,2], index: 1, kind: input, shape index: {}]   ;;  %s1419_s2 = inlined_call_operand.hbm [shape: bf16[64,128], index: 2, kind: input, shape index: {}]   ;;  %s1420_s3 = inlined_call_operand.vmem [shape: bf16[20,128], index: 3, kind: input, shape index: {}]   ;;  %s1421_s4 = inlined_call_operand.hbm [shape: f32[128,128], index: 4, kind: input, shape index: {}]   ;;  %s1422_s5 = inlined_call_operand.vmem [shape: f32[1,128], index: 5, kind: input, shape index: {}]   ;;  %s1423_s6 = inlined_call_operand.hbm [shape: f32[8,128], index: 6, kind: output, shape index: {}]  }
   0x1   :  { %1425 = sst [smem:[#allocation14_spill]] %s1417_s0 }
   0x2   :  { %11 = vsyncpa [#allocation4], 0 }
   0x3   :  { %12 = vsyncpa [#allocation7], 0 }
   0x4   :  { %14 = vsyncpa [#allocation7 + $0x1], 0 }
   0x5   :  { %15 = vsyncpa [#allocation5], 0  ;;  %s1219_s21 = smov 0   ;;  %s1221_s22 = smov 0  }
   0x6   :  { %s1223_s23 = smov 0   ;;  %s1225_s24 = smov 0  }
   0x7   :  { %s1227_s25 = smov 0   ;;  %s1229_s26 = smov 0  }
   0x8 LB: > { %s1248_s27 = sadd.s32 4294967295, %s1158_s26   ;;  %p99_p0 = scmp.ne.s32.totalorder %s1146_s23, %s1142_s22  ;;  %s1158_s26 = sphi %s1229_s26, %s21_s26   ;;  %s1154_s25 = sphi %s1227_s25, %s1439_s25   ;;  %s1150_s24 = sphi %s1225_s24, %s1438_s24   ;;  %s1146_s23 = sphi %s1223_s23, %s1437_s23   ;;  %s1142_s22 = sphi %s1221_s22, %s1436_s22   ;;  %s1138_s21 = sphi %s1219_s21, %s1435_s21  }
   0x9   : > { %p100_p1 = scmp.eq.s32.totalorder %s1158_s26, 0  ;;  %p105_p2 = scmp.ne.s32.totalorder %s1142_s22, %s1138_s21 }
   0xa   : > { %p1424_p3 = scmp.eq.s32.totalorder %s1248_s27, 0  ;;  %p760_p4 = scmp.ge.s32.totalorder %s1158_s26, 1 }
   0xb   : > { %p101_p5 = por %p100_p1, %p99_p0  ;;  %p205_p6 = scmp.lt.s32.totalorder %s1158_s26, 3 }
   0xc   : > { %p1259_p7 = por %p1424_p3, %p105_p2  ;;  %s1160_s30 = smov [#allocation8]  }
   0xd   : > { %p1263_p8 = pnand %p760_p4, %p205_p6  ;;  %s240_s7 = sshll.u32 %s1160_s30, 4  ;;  %s241_s7 = int_to_ptr.vmem [resolvable:$true] %s240_s7 }
   0xe   : > { %p898_p11 = scmp.lt.s32.totalorder %s1158_s26, 2  ;;  %s1003_s10 = scalar_lea.vmem %s241_s7, 2048 }
   0xf   : > { %p885_p9 = pneg %p1263_p8  ;;  %p1004_p0 = scmp.ne.s32.totalorder %s241_s7, %s1003_s10 }
  0x10   : > { %p1276_p12 = pnand %p898_p11, %p101_p5  ;;  %p1011_p4 = scmp.lt.s32.totalorder %s241_s7, %s241_s7 }
  0x11   : > { %p1271_p10 = pnand %p885_p9, %p1424_p3  ;;  %p1012_p6 = scmp.lt.s32.totalorder %s1003_s10, %s1003_s10 }
  0x13   : > { %p994_p13 = pneg %p1271_p10  ;;  %p1013_p9 = por %p1012_p6, %p1011_p4 }
  0x15   : > { %p1006_p1 = pnand %p1004_p0, %p994_p13 }
  0x17   : > { %p1007_p2 = pneg %p1006_p1 }
  0x19   : > { %p1014_p3 = pnand %p1013_p9, %p1007_p2 }
  0x1b   : > { %1017 = shalt.err (!%p1014_p3)
}
  0x1c   : > { %s1161_s11 = smov 128   ;;  %s1162_s12 = smov 8  }
  0x1d   : > { %891 = dma.hbm_to_vmem [thread:$0]  (!%p1271_p10), %s1421_s4, 2048, %s241_s7, [#allocation7], %s1161_s11, %s1161_s11, %s1162_s12  }
  0x1e   : > { %s1163_s15 = smov [#allocation3]  }
  0x1f   : > { %s220_s16 = sshll.u32 %s1163_s15, 4  ;;  %s221_s16 = int_to_ptr.vmem [resolvable:$true] %s220_s16 }
  0x20   : > { %s1029_s17 = scalar_lea.vmem %s221_s16, 128  ;;  %p1037_p1 = scmp.lt.s32.totalorder %s221_s16, %s221_s16 }
  0x21   : > { %p1030_p5 = scmp.ne.s32.totalorder %s221_s16, %s1029_s17  ;;  %p1038_p3 = scmp.lt.s32.totalorder %s1029_s17, %s1029_s17 }
  0x23   : > { %p1032_p11 = pnand %p1030_p5, %p994_p13  ;;  %p1039_p2 = por %p1038_p3, %p1037_p1 }
  0x25   : > { %p1033_p0 = pneg %p1032_p11 }
  0x27   : > { %p1040_p4 = pnand %p1039_p2, %p1033_p0 }
  0x29   : > { %1043 = shalt.err (!%p1040_p4)
}
  0x2a   : > { %s1430_s0 = sld [smem:[#allocation14_spill]]  ;;  %s30_s20 = sadd.s32 1, %s1154_s25 }
  0x2b   : > { %s92_s21 = sadd.s32 1, %s1146_s23  ;;  %p31_p13 = scmp.ge.s32.totalorder %s30_s20, 2 }
  0x2c   : > { %s257_s30 = sand.u32 1, %s1158_s26   ;;  %s259_s7 = sand.u32 1, %s1146_s23  }
  0x2d   : > { %s1441_s20 = smov (%p31_p13, %s30_s20), 0  ;;  %s765_s8 = sshll.u32 %s259_s7, 4 }
  0x2e   : > { %s796_s10 = sshll.u32 %s1154_s25, 8  ;;  %s89_s11 = ssub.s32 %s1154_s25, %s1441_s20 }
  0x2f   : > { %p90_p6 = scmp.eq.s32.totalorder %s89_s11, 0  ;;  %s267_s14 = scalar_lea.hbm %s1419_s2, %s796_s10 }
  0x30   : > { %888 = dma.hbm_to_vmem [thread:$0]  (!%p1271_p10), %s1430_s0, 128, %s221_s16, [#allocation4]  }
  0x31   : > { %s261_s15 = scalar_lea.vmem [#allocation6], %s765_s8  ;;  %s258_s18 = scalar_lea.sflag [#allocation7], %s257_s30 }
  0x32   : > { %s268_s17 = sshll.u32 %s261_s15, 4  ;;  %p1046_p10 = pneg %p1276_p12  ;;  %s269_s17 = int_to_ptr.vmem [resolvable:$true] %s268_s17 }
  0x33   : > { %s1311_s16 = scalar_select %p90_p6, %s1146_s23, %s92_s21  }
  0x34   : > { %s1057_s19 = scalar_lea.vmem %s269_s17, 256  ;;  %s1164_s7 = smov [#allocation6]  }
  0x35   : > { %p1058_p9 = scmp.ne.s32.totalorder %s269_s17, %s1057_s19  ;;  %s1062_s0 = sshll.u32 %s1164_s7, 4  ;;  %s1063_s0 = int_to_ptr.vmem [resolvable:$false] %s1062_s0 }
  0x36   : > { %s1064_s11 = scalar_lea.vmem %s1063_s0, 512  ;;  %p1065_p0 = scmp.lt.s32.totalorder %s269_s17, %s1063_s0 }
  0x37   : > { %p1060_p5 = pnand %p1058_p9, %p1046_p10  ;;  %p1066_p1 = scmp.lt.s32.totalorder %s1064_s11, %s1057_s19 }
  0x39   : > { %p1061_p11 = pneg %p1060_p5  ;;  %p1067_p3 = por %p1066_p1, %p1065_p0 }
  0x3b   : > { %p1068_p2 = pnand %p1067_p3, %p1061_p11 }
  0x3d   : > { %1071 = shalt.err (!%p1068_p2)
}
  0x3e   : > { %s1165_s8 = smov 64   ;;  %s1166_s21 = smov 4  }
  0x3f   : > { %895 = dma.hbm_to_vmem [thread:$0]  (!%p1276_p12), %s267_s14, 256, %s269_s17, %s258_s18, %s1165_s8, %s1165_s8, %s1166_s21  }
  0x40   : > { %280 = sbr.rel (%p1263_p8) target bundleno = 980 (0x3d4), region = 44  ;;  %p1431_p4 = scmp.eq.s32.totalorder (!%p1263_p8), %s1248_s27, 0 }
  0x45   : > { %1121 = dma.done.wait (%p1431_p4), [#allocation4], 128   ;;  %p1432_p13 = pmov %p1431_p4 }
  0x46   : > { %s286_s0 = sand.u32 1, %s1248_s27   ;;  %s288_s30 = sand.u32 1, %s1142_s22  }
  0x47   : > { %1123 = vsyncadd (%p1432_p13), [#allocation4], 4294967168  ;;  %s1325_s10 = sshll.u32 %s288_s30, 4  ;;  %s287_s12 = scalar_lea.sflag [#allocation7], %s286_s0 }
  0x48   : > { %s290_s9 = scalar_lea.vmem [#allocation6], %s1325_s10 }
  0x49   : > { %1125 = dma.done.wait (%p1259_p7), %s287_s12, 256  }
  0x4a   : > { %1127 = vsyncadd (%p1259_p7), %s287_s12, 4294967040  ;;  %p1433_p8 = pmov %p1431_p4 }
  0x4b   : > { %p1434_p12 = pmov %p1431_p4 }
  0x4c   : > { %1129 = dma.done.wait (%p1433_p8), [#allocation7], 2048  }
  0x4d   : > { %1131 = vsyncadd (%p1434_p12), [#allocation7], 4294965248  ;;  %p772_p6 = scmp.ne.s32.totalorder %s1150_s24, 0 }
  0x4f   : > { %331 = sbr.rel (%p772_p6) target bundleno = 86 (0x56), region = 60 }
  0x54   : > { %v1167_v0 = vmov 0.0  }
  0x55   : > { %332 = vst [vmem:[#allocation2] sm:$0xff] %v1167_v0 }
  0x56 PF: > { %v333_v1 = vld [vmem:[#allocation3] sm:$0xff]  ;;  %v1168_v2 = vmov 2   ;;  %v1169_v3 = vmov 0   ;;  %v1170_v4 = vmov 0.0   ;;  %v1171_v5 = vmov 3   ;;  %v984_v12 = vld [vmem:[%s290_s9] sm:$0xff]  }
  0x57   : > { %976 = vset.pattern.permute.xlu1 %v1168_v2  ;;  %974 = vset.pattern.permute.xlu0 %v1169_v3  ;;  %v1172_v6 = vmov 1   ;;  %v1173_v7 = vmov 4   ;;  %v1174_v8 = vmov 5   ;;  %v983_v9 = vld [vmem:[%s290_s9 + $0x8] sm:$0xff]   ;;  %v1175_v10 = vmov 6   ;;  %s773_s28 = sshll.u32 %s1150_s24, 5 }
  0x58   : > { %354 = vperm.xlu1 %976, %v333_v1   ;;  %340 = vperm.xlu0 %974, %v333_v1   ;;  %v1176_v11 = vmov 7   ;;  %vm1177_vm0 = vmmov 0   ;;  %v335_v13 = vlaneseq  ;;  %v337_v15 = vstv %s773_s28  ;;  %p785_p7 = scmp.ne.s32.totalorder %s1150_s24, 1 }
  0x59   : > { %820 = vmatprep.subr.bf16.mxu0 %v1170_v4  ;;  %824 = vmatprep.mubr.msk.bf16.mxu0 %vm1177_vm0, %v1170_v4  ;;  %vm413_vm9 = vcmask 261120  }
  0x5a   : > { %821 = vmatpush3.bf16.msra.mxu0 %v983_v9  ;;  %v1342_v14 = vand.u32 127, %v335_v13 }
  0x5b   : > { %822 = vmatprep.subr.bf16.mxu0 %v1170_v4 }
  0x5c   : > { %977 = vset.pattern.permute.xlu1 %v1171_v5  ;;  %975 = vset.pattern.permute.xlu0 %v1172_v6  ;;  %v338_v18 = vadd.s32 %v337_v15, %v1342_v14  ;;  %v396_v41 = vld [vmem:[#allocation2] sm:$0xff] }
  0x5d   : > { %361 = vperm.xlu1 %977, %v333_v1   ;;  %347 = vperm.xlu0 %975, %v333_v1  }
  0x5e   : > { %823 = vmatpush3.bf16.msra.mxu0 %v984_v12 }
  0x61   : > { %978 = vset.pattern.permute.xlu1 %v1173_v7  ;;  %979 = vset.pattern.permute.xlu0 %v1174_v8 }
  0x62   : > { %368 = vperm.xlu1 %978, %v333_v1   ;;  %375 = vperm.xlu0 %979, %v333_v1  }
  0x66   : > { %980 = vset.pattern.permute.xlu1 %v1175_v10  ;;  %982 = vset.pattern.permute.xlu0 %v1176_v11 }
  0x67   : > { %382 = vperm.xlu1 %980, %v333_v1  }
  0x6b   : > { %981 = vset.pattern.permute.xlu1 %v1176_v11 }
  0x6c   : > { %389 = vperm.xlu1 %981, %v333_v1  }
  0xd3   : > { %v355_v16 = vpop.permute.xlu1 %354  ;;  %v341_v17 = vpop.permute.xlu0 %340 }
  0xd4   : > { %vm342_vm1 = vcmp.eq.s32.totalorder %v341_v17, %v338_v18  ;;  %vm356_vm2 = vcmp.eq.s32.totalorder %v355_v16, %v338_v18 }
  0xd5   : > { %v774_v21 = vsel %vm342_vm1, 1.0, %v1170_v4  ;;  %v776_v24 = vsel %vm356_vm2, 1.0, %v1170_v4 }
  0xd8   : > { %v362_v19 = vpop.permute.xlu1 %361  ;;  %v348_v20 = vpop.permute.xlu0 %347 }
  0xd9   : > { %vm349_vm3 = vcmp.eq.s32.totalorder %v348_v20, %v338_v18  ;;  %vm363_vm4 = vcmp.eq.s32.totalorder %v362_v19, %v338_v18 }
  0xda   : > { %v775_v22 = vsel %vm349_vm3, 1.0, %v1170_v4  ;;  %v777_v28 = vsel %vm363_vm4, 1.0, %v1170_v4 }
  0xdb   : > { %v352_v23 = vadd.f32 %v775_v22, %v774_v21 }
  0xdd   : > { %v359_v25 = vadd.f32 %v776_v24, %v352_v23  ;;  %v369_v26 = vpop.permute.xlu1 %368  ;;  %v376_v27 = vpop.permute.xlu0 %375 }
  0xde   : > { %vm370_vm5 = vcmp.eq.s32.totalorder %v369_v26, %v338_v18  ;;  %vm377_vm6 = vcmp.eq.s32.totalorder %v376_v27, %v338_v18 }
  0xdf   : > { %v366_v29 = vadd.f32 %v777_v28, %v359_v25  ;;  %v778_v30 = vsel %vm370_vm5, 1.0, %v1170_v4  ;;  %v779_v32 = vsel %vm377_vm6, 1.0, %v1170_v4 }
  0xe1   : > { %v373_v31 = vadd.f32 %v778_v30, %v366_v29 }
  0xe2   : > { %v383_v33 = vpop.permute.xlu1 %382 }
  0xe3   : > { %vm384_vm7 = vcmp.eq.s32.totalorder %v383_v33, %v338_v18  ;;  %v380_v34 = vadd.f32 %v779_v32, %v373_v31 }
  0xe4   : > { %v780_v35 = vsel %vm384_vm7, 1.0, %v1170_v4 }
  0xe5   : > { %v387_v37 = vadd.f32 %v780_v35, %v380_v34 }
  0xe7   : > { %v390_v36 = vpop.permute.xlu1 %389 }
  0xe8   : > { %vm391_vm8 = vcmp.eq.s32.totalorder %v390_v36, %v338_v18 }
  0xe9   : > { %v781_v38 = vsel %vm391_vm8, 1.0, %v1170_v4 }
  0xea   : > { %v394_v39 = vadd.f32 %v781_v38, %v387_v37 }
  0xec   : > { %v395_v40 = vpack.c.bf16 %v394_v39, %v394_v39 }
  0xee   : > { %825 = vmatmul.mubr.msk.bf16.vlgmr.msra.gmra.mxu0 %vm413_vm9, %v395_v40 }
 0x1ae   : > { %v451_v42 = vpop.f32.mrf.mxu0 }
 0x1af   : > { %v457_v43 = vadd.f32 %v451_v42, %v396_v41 }
 0x1b0   : > { %v826_v44 = vpop.f32.mrf.mxu0  ;;  %462 = sbr.rel (%p785_p7) target bundleno = 965 (0x3c5), region = 64 }
 0x1b1   : > { %458 = vst [vmem:[#allocation2] sm:$0xff] %v457_v43 }
 0x1b2   : > { %v454_v45 = vpop.f32.mrf.mxu0 }
 0x1b4   : > { %v827_v46 = vpop.f32.mrf.mxu0 }
 0x1b5   : > { %v479_v48 = vld [vmem:[%s1418_s1] sm:$0xff]  ;;  %v1178_v49 = vmov 0   ;;  %v1179_v51 = vmov 0.0   ;;  %vm512_vm10 = vcmask 1041408   ;;  %v1180_v56 = vmov 1   ;;  %v572_v57 = vld [vmem:[#allocation8 + $0x78] sm:$0xff] }
 0x1b6   : > { %985 = vset.pattern.permute.xlu0 %v1178_v49  ;;  %828 = vmatprep.subr.bf16.mxu0 %v1179_v51  ;;  %v988_v52 = vld [vmem:[%s1420_s3 + $0x8] ss:$0 sps:$4 sm:$0x33]   ;;  %v487_v53 = vadd.s32 8, %v479_v48  ;;  %v989_v55 = vld [vmem:[%s1420_s3] sm:$0xff]   ;;  %vm1181_vm11 = vmmov 0  }
 0x1b7   : > { %481 = vperm.xlu0 %985, %v479_v48   ;;  %836 = vmatprep.subr.mxu1 %v1179_v51  ;;  %v514_v54 = vsel %vm512_vm10, %v988_v52, 0  ;;  %v571_v58 = vld [vmem:[#allocation8 + $0x70] sm:$0xff]  ;;  %v1182_v59 = vmov 32   ;;  %v570_v60 = vld [vmem:[#allocation8 + $0x68] sm:$0xff]  ;;  %v569_v61 = vld [vmem:[#allocation8 + $0x60] sm:$0xff]  ;;  %vm508_vm15 = vcmask 162816  }
 0x1b8   : > { %v1346_v47 = vld [vmem:[#allocation2] sm:$0xff]  ;;  %829 = vmatpush3.bf16.msra.mxu0 %v514_v54  ;;  %832 = vmatprep.mubr.msk.bf16.mxu0 %vm1181_vm11, %v1179_v51  ;;  %v568_v62 = vld [vmem:[#allocation8 + $0x58] sm:$0xff]  ;;  %v566_v2 = vld [vmem:[#allocation8 + $0x48] sm:$0xff] }
 0x1b9   : > { %v464_v50 = vmax.f32 %v1346_v47, 1.0  ;;  %830 = vmatprep.subr.bf16.mxu0 %v1179_v51  ;;  %868 = vmatprep.mubr.msk.f32.mxu1 %vm1181_vm11, %v1179_v51  ;;  %vm466_vm12 = vcmp.eq.f32.partialorder %v1346_v47, 0.0  ;;  %v567_v0 = vld [vmem:[#allocation8 + $0x50] sm:$0xff]  ;;  %v565_v3 = vld [vmem:[#allocation8 + $0x40] sm:$0xff]  ;;  %v564_v4 = vld [vmem:[#allocation8 + $0x38] sm:$0xff] }
 0x1ba   : > { %987 = vset.pattern.permute.xlu1 %v1182_v59  ;;  %837 = vmatpush3.msra.mxu1 %v572_v57  ;;  %v473_v1 = vsel %vm466_vm12, 1, %v1178_v49  ;;  %v563_v5 = vld [vmem:[#allocation8 + $0x30] sm:$0xff]  ;;  %v562_v6 = vld [vmem:[#allocation8 + $0x28] sm:$0xff]  ;;  %v561_v7 = vld [vmem:[#allocation8 + $0x20] sm:$0xff] }
 0x1bb   : > { %990 = vrcp.f32 %v464_v50  ;;  %986 = vset.pattern.permute.xlu0 %v1180_v56  ;;  %838 = vmatprep.subr.mxu1 %v1179_v51  ;;  %v560_v8 = vld [vmem:[#allocation8 + $0x18] sm:$0xff]  ;;  %v559_v9 = vld [vmem:[#allocation8 + $0x10] sm:$0xff]  ;;  %v558_v17 = vld [vmem:[#allocation8 + $0x8] sm:$0xff] }
 0x1bc   : > { %489 = vperm.xlu0 %986, %v487_v53   ;;  %831 = vmatpush3.bf16.msra.mxu0 %v989_v55  ;;  %v557_v18 = vld [vmem:[#allocation8] sm:$0xff]  ;;  %v791_v27 = vld [vmem:[%s1422_s5] ss:$0 sm:$0xff] }
 0x1bd   : > { %839 = vmatpush3.msra.mxu1 %v571_v58 }
 0x1be   : > { %840 = vmatprep.subr.mxu1 %v1179_v51 }
 0x1bf   : > { %841 = vmatpush3.msra.mxu1 %v570_v60 }
 0x1c0   : > { %842 = vmatprep.subr.mxu1 %v1179_v51 }
 0x1c1   : > { %843 = vmatpush3.msra.mxu1 %v569_v61 }
 0x1c2   : > { %844 = vmatprep.subr.mxu1 %v1179_v51 }
 0x1c3   : > { %845 = vmatpush3.msra.mxu1 %v568_v62 }
 0x1c4   : > { %846 = vmatprep.subr.mxu1 %v1179_v51 }
 0x1c5   : > { %847 = vmatpush3.msra.mxu1 %v567_v0 }
 0x1c6   : > { %848 = vmatprep.subr.mxu1 %v1179_v51 }
 0x1c7   : > { %849 = vmatpush3.msra.mxu1 %v566_v2 }
 0x1c8   : > { %v991_v63 = vpop.eup %990  ;;  %850 = vmatprep.subr.mxu1 %v1179_v51 }
 0x1c9   : > { %469 = vperm.xlu1 %987, %v991_v63   ;;  %851 = vmatpush3.msra.mxu1 %v565_v3 }
 0x1ca   : > { %852 = vmatprep.subr.mxu1 %v1179_v51 }
 0x1cb   : > { %853 = vmatpush3.msra.mxu1 %v564_v4 }
 0x1cc   : > { %854 = vmatprep.subr.mxu1 %v1179_v51 }
 0x1cd   : > { %475 = vperm.xlu1 %987, %v473_v1   ;;  %855 = vmatpush3.msra.mxu1 %v563_v5 }
 0x1ce   : > { %856 = vmatprep.subr.mxu1 %v1179_v51 }
 0x1cf   : > { %857 = vmatpush3.msra.mxu1 %v562_v6 }
 0x1d0   : > { %858 = vmatprep.subr.mxu1 %v1179_v51 }
 0x1d1   : > { %859 = vmatpush3.msra.mxu1 %v561_v7 }
 0x1d2   : > { %860 = vmatprep.subr.mxu1 %v1179_v51 }
 0x1d3   : > { %861 = vmatpush3.msra.mxu1 %v560_v8 }
 0x1d4   : > { %862 = vmatprep.subr.mxu1 %v1179_v51 }
 0x1d5   : > { %863 = vmatpush3.msra.mxu1 %v559_v9 }
 0x1d6   : > { %864 = vmatprep.subr.mxu1 %v1179_v51 }
 0x1d7   : > { %865 = vmatpush3.msra.mxu1 %v558_v17 }
 0x1d8   : > { %866 = vmatprep.subr.mxu1 %v1179_v51 }
 0x1d9   : > { %867 = vmatpush3.msra.mxu1 %v557_v18 }
 0x232   : > { %v482_v10 = vpop.permute.xlu0 %481 }
 0x233   : > { %vm483_vm13 = vcmp.eq.s32.totalorder %v482_v10, %v1342_v14 }
 0x234   : > { %v786_v12 = vsel %vm483_vm13, 1.0, %v1179_v51 }
 0x237   : > { %v490_v11 = vpop.permute.xlu0 %489 }
 0x238   : > { %vm491_vm14 = vcmp.eq.s32.totalorder %v490_v11, %v1342_v14 }
 0x239   : > { %v787_v13 = vsel %vm491_vm14, 1.0, %v1179_v51 }
 0x23a   : > { %v494_v15 = vadd.f32 %v787_v13, %v786_v12 }
 0x23c   : > { %v495_v16 = vpack.c.bf16 %v494_v15, %v494_v15 }
 0x23e   : > { %833 = vmatmul.mubr.msk.bf16.vlgmr.msra.gmra.mxu0 %vm508_vm15, %v495_v16 }
 0x244   : > { %v470_v19 = vpop.permute.xlu1 %469 }
 0x245   : > { %v472_v21 = vmul.f32 %v470_v19, %v1346_v47 }
 0x248   : > { %v476_v20 = vpop.permute.xlu1 %475 }
 0x249   : > { %vm477_vm0 = vcmp.eq.s32.totalorder %v476_v20, 1 }
 0x24a   : > { %v478_v14 = vsel %vm477_vm0, 0.0, %v472_v21 }
 0x2fe   : > { %v550_v22 = vpop.f32.mrf.mxu0 }
 0x2ff   : > { %v556_v23 = vadd.f32 %v550_v22, %v478_v14 }
 0x300   : > { %v834_v24 = vpop.f32.mrf.mxu0 }
 0x301   : > { %869 = vmatmul.mubr.f32.vlgmr.msra.gmra.mxu1 %v556_v23 }
 0x302   : > { %v553_v25 = vpop.f32.mrf.mxu0 }
 0x304   : > { %v835_v26 = vpop.f32.mrf.mxu0 }
 0x3c1   : > { %v646_v28 = vpop.f32.mrf.mxu1 }
 0x3c2   : > { %v647_v29 = vadd.f32 %v791_v27, %v646_v28 }
 0x3c3   : > { %v870_v30 = vpop.f32.mrf.mxu1 }
 0x3c4   : > { %650 = vst [vmem:[#allocation9] sm:$0xff] %v647_v29 }
 0x3c5 PF: > { %p901_p10 = scmp.eq.s32.totalorder %s1248_s27, 1  ;;  %s1183_s7 = smov [#allocation9]  }
 0x3c6   : > { %s660_s11 = sshll.u32 %s1183_s7, 4  ;;  %s661_s11 = int_to_ptr.vmem [resolvable:$true] %s660_s11 }
 0x3c7   : > { %s1072_s8 = scalar_lea.vmem %s661_s11, 128  ;;  %p1079_p0 = scmp.lt.s32.totalorder %s661_s11, %s661_s11 }
 0x3c8   : > { %p1073_p9 = scmp.ne.s32.totalorder %s661_s11, %s1072_s8  ;;  %p1080_p1 = scmp.lt.s32.totalorder %s1072_s8, %s1072_s8 }
 0x3ca   : > { %p1074_p5 = pnand %p1073_p9, %p901_p10  ;;  %p1081_p3 = por %p1080_p1, %p1079_p0 }
 0x3cc   : > { %p1075_p11 = pneg %p1074_p5 }
 0x3ce   : > { %p1082_p2 = pnand %p1081_p3, %p1075_p11 }
 0x3d0   : > { %1085 = shalt.err (!%p1082_p2)
}
 0x3d1   : > { %882 = dma.vmem_to_hbm [thread:$0]  (%p901_p10), %s661_s11, 128, %s1423_s6, [#allocation5]  }
 0x3d2   : > { %1133 = dma.done.wait (%p901_p10), [#allocation5], 128  }
 0x3d3   : > { %1135 = vsyncadd (%p901_p10), [#allocation5], 4294967168 }
 0x3d4 PF: > { %s21_s26 = sadd.s32 1, %s1158_s26   ;;  %s1435_s21 = smov %s1142_s22 }
 0x3d5   : > { %p18_p4 = scmp.ge.s32.totalorder %s21_s26, 4   ;;  %s1436_s22 = smov %s1146_s23 }
 0x3d6   : > { %s1437_s23 = smov %s1311_s16  ;;  %s1438_s24 = smov %s1154_s25 }
 0x3d7   : > { %s1439_s25 = smov %s1441_s20  ;;  %20 = sbr.rel (!%p18_p4) target bundleno = 8 (0x8), region = 103 }
 0x3dc   :  { %673 = vsyncpa [#allocation4], 1 }
 0x3dd   :  { %675 = vsyncpa [#allocation4 + $0x1], 1 }
 0x3de   :  { %676 = vsyncpa [#allocation7], 1 }
 0x3df   :  { %678 = vsyncpa [#allocation7 + $0x1], 1 }
 0x3e0   :  { %679 = vsyncpa [#allocation5], 1 }
 0x3e1   :  { %681 = vsyncpa [#allocation5 + $0x1], 1 }

</bundles_post_ra>
